<compile_context>
chip_gen: v7x
topology: tpu7x:2x2x1
jax: 0.10.0
libtpu: 0.0.40
codegen_flags: <defaults>
</compile_context>

<pallas_src>
import functools
import math

import jax
import jax.numpy as jnp
from jax.experimental import pallas as pl
from jax.experimental.pallas import tpu as pltpu


# ---------------------------------------------------------------------------
# Init-time table construction (mirrors the torch __init__ exactly)
# ---------------------------------------------------------------------------
def _sincos_table(d_model, max_len, dtype):
    position = jnp.arange(max_len, dtype=jnp.float32)[:, None]          # (max_len, 1)
    div_term = jnp.exp(
        jnp.arange(0, d_model, 2, dtype=jnp.float32) * -(math.log(10000.0) / d_model)
    )                                                                    # (ceil(d/2),)
    angles = position * div_term                                         # (max_len, ceil(d/2))
    pe = jnp.zeros((max_len, d_model), dtype=jnp.float32)
    pe = pe.at[:, 0::2].set(jnp.sin(angles))
    # slice keeps this valid for odd d_model too (identical to torch for even d_model)
    pe = pe.at[:, 1::2].set(jnp.cos(angles)[:, : d_model // 2])
    return pe.astype(dtype)


def make_positional_encoding(d_model, max_len=5000, dtype=jnp.float32):
    """(max_len, 1, d_model) table, built once at init in the model dtype."""
    return _sincos_table(d_model, max_len, dtype)[:, None, :]


def make_positional_encoding_tiled(d_model, batch, max_len=5000, dtype=jnp.float32):
    """(max_len, batch*d_model) lane-dense table for the small-B/D fast path.

    Row s holds pe[s] repeated `batch` times, matching x.reshape(S, B*D)."""
    pe = _sincos_table(d_model, max_len, dtype)
    return jnp.tile(pe, (1, batch))


# ---------------------------------------------------------------------------
# Kernel (pure broadcast add; memory-bound)
# ---------------------------------------------------------------------------
def _pe_add_kernel(x_ref, pe_ref, o_ref):
    o_ref[...] = x_ref[...] + pe_ref[...]


# ---------------------------------------------------------------------------
# Tile sizing
# ---------------------------------------------------------------------------
_SUBLANES = 8


def _dtype_sublane_pack(dtype):
    # sub-32-bit dtypes pack along sublanes -> keep ts a multiple of 8 * packing
    return max(1, 4 // jnp.dtype(dtype).itemsize) * _SUBLANES


def _auto_seq_tile(S, bytes_per_seq_row, dtype):
    try:
        vmem_bytes = pltpu.get_tpu_info().vmem_capacity_bytes
    except Exception:
        vmem_bytes = 64 * 1024 * 1024                 # conservative: v7x physical VMEM
    # ~2 MiB per tile-set (x + pe + out rows), <= 1/16 of physical VMEM for headroom
    budget = min(2 * 1024 * 1024, vmem_bytes // 16)
    ts = max(1, budget // max(int(bytes_per_seq_row), 1))
    # keep >= 8 grid steps when the sequence allows (v7x megacore sharding)
    ts = min(ts, max(1, pl.cdiv(S, 8)))
    pack = _dtype_sublane_pack(dtype)
    ts = max(pack, (ts // pack) * pack)
    return int(min(ts, S))


# ---------------------------------------------------------------------------
# pallas_call wrappers
# ---------------------------------------------------------------------------
def _pe_add_2d(x2, pe_table, *, donate_x):
    # x2: (S, B*D), pe_table: (max_len, B*D) pre-tiled at init
    S, F = x2.shape
    itemsize = jnp.dtype(x2.dtype).itemsize
    ts = _auto_seq_tile(S, 3 * F * itemsize, x2.dtype)
    return pl.pallas_call(
        _pe_add_kernel,
        out_shape=jax.ShapeDtypeStruct((S, F), x2.dtype),
        grid=(pl.cdiv(S, ts),),
        in_specs=[
            pl.BlockSpec((ts, F), lambda i: (i, 0)),
            pl.BlockSpec((ts, F), lambda i: (i, 0)),   # only rows < S are ever read
        ],
        out_specs=pl.BlockSpec((ts, F), lambda i: (i, 0)),
        compiler_params=pltpu.CompilerParams(dimension_semantics=("parallel",)),
        cost_estimate=pl.CostEstimate(
            flops=S * F, transcendentals=0, bytes_accessed=3 * S * F * itemsize),
        input_output_aliases={0: 0} if donate_x else {},
    )(x2, pe_table)


def _pe_add_3d(x, pe_table, *, donate_x):
    # x: (S, B, D), pe_table: (max_len, 1, D) -- VPU broadcasts over the batch dim
    S, B, D = x.shape
    itemsize = jnp.dtype(x.dtype).itemsize
    ts = _auto_seq_tile(S, (2 * B * D + D) * itemsize, x.dtype)
    return pl.pallas_call(
        _pe_add_kernel,
        out_shape=jax.ShapeDtypeStruct((S, B, D), x.dtype),
        grid=(pl.cdiv(S, ts),),
        in_specs=[
            pl.BlockSpec((ts, B, D), lambda i: (i, 0, 0)),
            pl.BlockSpec((ts, 1, D), lambda i: (i, 0, 0)),   # only rows < S are ever read
        ],
        out_specs=pl.BlockSpec((ts, B, D), lambda i: (i, 0, 0)),
        compiler_params=pltpu.CompilerParams(dimension_semantics=("parallel",)),
        cost_estimate=pl.CostEstimate(
            flops=S * B * D, transcendentals=0,
            bytes_accessed=(2 * S * B * D + S * D) * itemsize),
        input_output_aliases={0: 0} if donate_x else {},
    )(x, pe_table)


@functools.partial(jax.jit, static_argnames=("donate_x",))
def positional_encoding_add(x, pe_table, *, donate_x=False):
    """Forward pass: x (S, B, D) -> x + encoding[:S].

    pe_table is built once at init:
      * make_positional_encoding(...)          -> (max_len, 1, D)      generic path
      * make_positional_encoding_tiled(...)    -> (max_len, B*D)       lane-dense path
                                                   (use when B or D are small / unaligned)
    """
    S, B, D = x.shape
    if S > pe_table.shape[0]:
        raise ValueError(f"sequence length {S} exceeds max_len {pe_table.shape[0]}")
    pe_table = pe_table.astype(x.dtype)   # no-op when the table was built in the model dtype

    if pe_table.ndim == 2:                # lane-dense fast path
        if pe_table.shape[1] != B * D:
            raise ValueError("tiled pe table does not match (batch, d_model)")
        out = _pe_add_2d(x.reshape(S, B * D), pe_table, donate_x=donate_x)
        return out.reshape(S, B, D)

    return _pe_add_3d(x, pe_table, donate_x=donate_x)


def positional_encoding_ref(x, pe_table_3d):
    # Pure-JAX reference mirroring the PyTorch forward literally.
    S = x.shape[0]
    return x + pe_table_3d[:S].astype(x.dtype)


if __name__ == "__main__":
    # Small shapes implied by the module: x is (seq, batch, d_model).
    SEQ, BATCH, D_MODEL, MAX_LEN = 8, 2, 32, 64

    key = jax.random.PRNGKey(0)
    x = jax.random.normal(key, (SEQ, BATCH, D_MODEL), dtype=jnp.float32)

    # Built once at "module init" time, in the model dtype, in kernel-ready layout.
    pe_tiled = make_positional_encoding_tiled(D_MODEL, BATCH, max_len=MAX_LEN, dtype=x.dtype)
    pe_3d = make_positional_encoding(D_MODEL, max_len=MAX_LEN, dtype=x.dtype)

    # Lane-dense fast path (the one appropriate for these small B/D).
    out = jax.block_until_ready(positional_encoding_add(x, pe_tiled))
    # Generic (max_len, 1, D) path, exercised for coverage.
    out3 = jax.block_until_ready(positional_encoding_add(x, pe_3d))

    ref = positional_encoding_ref(x, pe_3d)
    assert out.shape == (SEQ, BATCH, D_MODEL)
    assert jnp.allclose(out, ref, atol=1e-6, rtol=1e-6)
    assert jnp.allclose(out3, ref, atol=1e-6, rtol=1e-6)

    print("KERNEL_OK")
</pallas_src>

<mosaic_0001>
module attributes {stable_mosaic.version = 11 : i64} {
  func.func @_pe_add_kernel(%arg0: i32, %arg1: memref<8x64xf32, #tpu.memory_space<vmem>>, %arg2: memref<8x64xf32, #tpu.memory_space<vmem>>, %arg3: memref<8x64xf32, #tpu.memory_space<vmem>>) attributes {dimension_semantics = [#tpu.dimension_semantics<parallel>], iteration_bounds = array<i64: 1>, scalar_prefetch = 0 : i64, scratch_operands = 0 : i64, tpu.core_type = #tpu.core_type<tc>, window_params = [{transform_indices = @transform_0, window_bounds = array<i64: 8, 64>}, {transform_indices = @transform_1, window_bounds = array<i64: 8, 64>}, {transform_indices = @transform_2, window_bounds = array<i64: 8, 64>}]} {
    %c0 = arith.constant 0 : index
    %c0_0 = arith.constant 0 : index
    %0 = vector.load %arg1[%c0, %c0_0] : memref<8x64xf32, #tpu.memory_space<vmem>>, vector<8x64xf32>
    %c0_1 = arith.constant 0 : index
    %c0_2 = arith.constant 0 : index
    %1 = vector.load %arg2[%c0_1, %c0_2] : memref<8x64xf32, #tpu.memory_space<vmem>>, vector<8x64xf32>
    %2 = arith.addf %0, %1 : vector<8x64xf32>
    %c0_3 = arith.constant 0 : index
    %c0_4 = arith.constant 0 : index
    %3 = vector.load %arg3[%c0_3, %c0_4] : memref<8x64xf32, #tpu.memory_space<vmem>>, vector<8x64xf32>
    tpu.vector_store %arg3[%c0_3, %c0_4], %2 {strides = array<i32>} : memref<8x64xf32, #tpu.memory_space<vmem>>, vector<8x64xf32>,
    return
  }
  func.func @transform_0(%arg0: i32) -> (i32, i32) {
    %c0_i32 = arith.constant 0 : i32
    %c0_i32_0 = arith.constant 0 : i32
    return %arg0, %c0_i32 : i32, i32
  }
  func.func @transform_1(%arg0: i32) -> (i32, i32) {
    %c0_i32 = arith.constant 0 : i32
    %c0_i32_0 = arith.constant 0 : i32
    return %arg0, %c0_i32 : i32, i32
  }
  func.func @transform_2(%arg0: i32) -> (i32, i32) {
    %c0_i32 = arith.constant 0 : i32
    %c0_i32_0 = arith.constant 0 : i32
    return %arg0, %c0_i32 : i32, i32
  }
}

</mosaic_0001>

<bundles_post_ra>
// kernel: positional_encoding_add.1
= control target key start
LH: loop header
LB: loop body
LE: loop exit
PB: predicated region body
PF: predicated region fallthrough
CT: control target
= control target key end

     0   :  { %7 = vsyncpa [#allocation3], 0  ;;  %s58_s9 = smov [#allocation2]   ;;  %s95_s0 = inlined_call_operand.vmem [shape: f32[8,64], index: 0, kind: input, shape index: {}]   ;;  %s96_s1 = inlined_call_operand.hbm [shape: f32[64,64], index: 1, kind: input, shape index: {}]   ;;  %s97_s2 = inlined_call_operand.vmem [shape: f32[8,64], index: 2, kind: output, shape index: {}]  }
   0x1   :  { %s16_s10 = sshll.u32 %s58_s9, 4  ;;  %s34_s13 = scalar_lea.hbm %s96_s1, 128  ;;  %s17_s10 = int_to_ptr.vmem [resolvable:$true] %s16_s10 }
   0x2   :  { %p35_p0 = scmp.ne.s32.totalorder %s96_s1, %s34_s13  ;;  %s36_s18 = scalar_lea.hbm %s96_s1, 1024 }
   0x3   :  { %p37_p1 = scmp.lt.u32.totalorder %s36_s18, %s34_s13  ;;  %p38_p2 = scmp.lt.u32.totalorder %s34_s13, %s96_s1 }
   0x5   :  { %p39_p3 = por %p38_p2, %p37_p1 }
   0x7   :  { %p40_p4 = pnand %p39_p3, %p35_p0 }
   0x9   :  { %43 = shalt.err (!%p40_p4)
}
   0xa   :  { %s44_s21 = scalar_lea.vmem %s17_s10, 128  ;;  %p49_p6 = scmp.lt.s32.totalorder %s17_s10, %s17_s10 }
   0xb   :  { %p45_p5 = scmp.ne.s32.totalorder %s17_s10, %s44_s21  ;;  %p50_p7 = scmp.lt.s32.totalorder %s44_s21, %s44_s21 }
   0xd   :  { %p51_p8 = por %p50_p7, %p49_p6 }
   0xf   :  { %p52_p9 = pnand %p51_p8, %p45_p5 }
  0x11   :  { %55 = shalt.err (!%p52_p9)
}
  0x12   :  { %19 = dma.hbm_to_vmem [thread:$0]  %s96_s1, 128, %s17_s10, [#allocation3]  }
  0x13   :  { %56 = dma.done.wait [#allocation3], 128  }
  0x14   :  { %57 = vsyncadd [#allocation3], 4294967168  ;;  %v23_v0 = vld [vmem:[%s95_s0] sm:$0xff]  ;;  %vm26_vm0 = vcmask 523264  }
  0x15   :  { %v24_v1 = vld [vmem:[#allocation2] sm:$0xff] }
  0x16   :  { %v25_v2 = vadd.f32 %v24_v1, %v23_v0 }
  0x18   :  { %27 = vst.msk [vmem:[%s97_s2] sm:$0xff] %vm26_vm0, %v25_v2 }
  0x19   :  { %32 = vsyncpa [#allocation3], 1 }

</bundles_post_ra>
